<compile_context>
chip_gen: v6e
topology: v6e:2x2x1
jax: 0.10.0
libtpu: 0.0.40
codegen_flags: <defaults>
</compile_context>

<pallas_src>
import jax
import jax.numpy as jnp
from jax.experimental import pallas as pl
from jax.experimental.pallas import tpu as pltpu


# ----------------------------------------------------------------------------
# Fused Pallas kernel: upsample(folded) -> conv1+bias+ReLU -> conv2+bias+ReLU
# (everything stays in VMEM; input read once, final activation written once)
# ----------------------------------------------------------------------------
def _decoder_block_kernel(xT_ref, b1cat_ref, w1cat_ref, b1_ref,
                          a2cat_ref, b2_ref, o_ref, tstk_ref, hs_ref):
    # xT_ref    : (1, W, Cin*H)         bf16  transposed input slab (lane = Cin*H)
    # b1cat_ref : (Cin*H, 3*Cmid*Hu)    bf16  conv1 row-mats (H-upsample folded),
    #                                         lane-concatenated over dx
    # w1cat_ref : (Wu, 3*W)             bf16  W-upsample composed with dx shift,
    #                                         lane-concatenated over dx
    # b1_ref    : (1, Cmid*Hu)          f32   conv1 bias, lane-major
    # a2cat_ref : (3*Cmid*Hu, Cout*Hu)  bf16  conv2 row-mats, row-concat over dx
    # b2_ref    : (1, Cout*Hu)          f32   conv2 bias, lane-major
    # o_ref     : (1, Wu, Cout*Hu)      f32   transposed output slab
    # tstk_ref  : (3*W, Cmid*Hu)        bf16  scratch (conv1 K restack)
    # hs_ref    : (Wu, 3*Cmid*Hu)       bf16  scratch (conv2 shifted-tap concat)
    w = xT_ref.shape[1]
    cmid_hu = b1_ref.shape[1]
    wu = o_ref.shape[1]

    xT = xT_ref[0]                                                # (W, Cin*H) bf16

    # ---- conv1 (bilinear 2x upsample folded into its weights) --------------
    # One wide-N matmul produces all three dx taps at once ...
    t_wide = jnp.dot(xT, b1cat_ref[...],
                     preferred_element_type=jnp.float32)          # (W, 3*Cmid*Hu)
    # ... restack the dx blocks onto the contraction (sublane) axis ...
    for dx in range(3):
        tstk_ref[dx * w:(dx + 1) * w, :] = (
            t_wide[:, dx * cmid_hu:(dx + 1) * cmid_hu].astype(tstk_ref.dtype))
    # ... and fold the W-upsample + horizontal taps in one deep-K matmul.
    y1 = jnp.dot(w1cat_ref[...], tstk_ref[...],
                 preferred_element_type=jnp.float32)              # (Wu, Cmid*Hu)
    h1 = jnp.maximum(y1 + b1_ref[...], 0.0)                       # f32, lane-dense

    # ---- conv2 --------------------------------------------------------------
    # Horizontal taps via XLU sublane rolls; zero the wrapped edge rows so the
    # circular roll matches 3x3/pad=1 zero-padding semantics.
    rows = jax.lax.broadcasted_iota(jnp.int32, h1.shape, 0)
    taps = (jnp.where(rows == 0, 0.0, pltpu.roll(h1, shift=1, axis=0)),       # wi = wo-1
            h1,                                                               # wi = wo
            jnp.where(rows == wu - 1, 0.0, pltpu.roll(h1, shift=wu - 1, axis=0)))  # wi = wo+1
    for dx in range(3):
        hs_ref[:, dx * cmid_hu:(dx + 1) * cmid_hu] = taps[dx].astype(hs_ref.dtype)
    # Single K-concatenated matmul (K = 3*Cmid*Hu) replaces 3 short launches.
    y2 = jnp.dot(hs_ref[...], a2cat_ref[...],
                 preferred_element_type=jnp.float32)              # (Wu, Cout*Hu)
    o_ref[0] = jnp.maximum(y2 + b2_ref[...], 0.0).astype(o_ref.dtype)


# ----------------------------------------------------------------------------
# Constant-matrix construction (runs ONCE, outside the jitted forward)
# ----------------------------------------------------------------------------
def _upsample_matrix(size):
    """(2*size, size) bilinear 2x interpolation matrix, align_corners=False
    (PyTorch nn.Upsample default: half-pixel centers, clamped neighbours)."""
    i = jnp.arange(2 * size, dtype=jnp.float32)
    src = jnp.maximum((i + 0.5) * 0.5 - 0.5, 0.0)
    i0 = jnp.floor(src).astype(jnp.int32)
    frac = src - i0.astype(jnp.float32)
    i1 = jnp.minimum(i0 + 1, size - 1)
    rows = jnp.arange(2 * size)
    u = jnp.zeros((2 * size, size), jnp.float32)
    u = u.at[rows, i0].add(1.0 - frac)
    u = u.at[rows, i1].add(frac)
    return u


def _conv_row_matrices(k_oihw, h_rows):
    """Per-dx banded matrices A_dx[(co,ho),(ci,hi)] = K[co,ci,hi-ho+1,dx]
    (zero when |hi-ho| > 1): vertical taps + H zero-padding of a 3x3/pad=1 conv,
    for activations stored as (C*h_rows, W) slabs."""
    c_out, c_in, _, _ = k_oihw.shape
    ho = jnp.arange(h_rows)[:, None]
    hi = jnp.arange(h_rows)[None, :]
    dy = hi - ho + 1
    valid = (dy >= 0) & (dy <= 2)
    dyc = jnp.clip(dy, 0, 2)
    mats = []
    for dx in range(3):
        kd = k_oihw[:, :, :, dx]                              # (c_out, c_in, 3)
        a = kd[:, :, dyc]                                     # (c_out, c_in, h, h)
        a = jnp.where(valid[None, None], a, 0.0)
        a = jnp.transpose(a, (0, 2, 1, 3)).reshape(c_out * h_rows, c_in * h_rows)
        mats.append(a)
    return jnp.stack(mats, 0)                                 # (3, c_out*h, c_in*h)


def init_decoder_block(key, in_channels, middle_channels, out_channels):
    k1, k2, k3, k4 = jax.random.split(key, 4)
    return {
        # PyTorch Conv2d weight layout: (out, in, kh, kw)
        "w1": 0.1 * jax.random.normal(k1, (middle_channels, in_channels, 3, 3), jnp.float32),
        "b1": 0.1 * jax.random.normal(k2, (middle_channels,), jnp.float32),
        "w2": 0.1 * jax.random.normal(k3, (out_channels, middle_channels, 3, 3), jnp.float32),
        "b2": 0.1 * jax.random.normal(k4, (out_channels,), jnp.float32),
    }


def make_decoder_block_constants(params, in_channels, h, w):
    """Fold upsample + vertical conv taps + dx concatenation into bf16 constants."""
    w1, b1 = params["w1"], params["b1"]
    w2, b2 = params["w2"], params["b2"]
    c_mid, c_out = w1.shape[0], w2.shape[0]
    hu, wu = 2 * h, 2 * w

    u_w = _upsample_matrix(w)                                          # (wu, w)
    v_h = _upsample_matrix(h)                                          # (hu, h)
    v_blk = jnp.kron(jnp.eye(in_channels, dtype=jnp.float32), v_h)     # (cin*hu, cin*h)

    a1 = _conv_row_matrices(w1, hu)                                    # (3, cmid*hu, cin*hu)
    a2 = _conv_row_matrices(w2, hu)                                    # (3, cout*hu, cmid*hu)
    b1m = jnp.einsum("dmr,rk->dmk", a1, v_blk)                         # (3, cmid*hu, cin*h)

    # W-upsample rows shifted by dx-1 with zero padding: w1cat[:, dx*w:(dx+1)*w][wo] = u[wo+dx-1].
    upad = jnp.concatenate([jnp.zeros((1, w), jnp.float32), u_w,
                            jnp.zeros((1, w), jnp.float32)], axis=0)   # (wu+2, w)
    w1cat = jnp.concatenate([upad[dx:dx + wu] for dx in range(3)], axis=1)   # (wu, 3*w)

    b1cat = jnp.concatenate([b1m[dx].T for dx in range(3)], axis=1)    # (cin*h, 3*cmid*hu)
    a2cat = jnp.concatenate([a2[dx].T for dx in range(3)], axis=0)     # (3*cmid*hu, cout*hu)

    return {
        "b1cat": b1cat.astype(jnp.bfloat16),
        "w1cat": w1cat.astype(jnp.bfloat16),
        "a2cat": a2cat.astype(jnp.bfloat16),
        "b1row": jnp.repeat(b1, hu).reshape(1, c_mid * hu),            # f32, lane-major
        "b2row": jnp.repeat(b2, hu).reshape(1, c_out * hu),            # f32, lane-major
    }


# ----------------------------------------------------------------------------
# decoder_block forward
# ----------------------------------------------------------------------------
@jax.jit
def decoder_block_forward(x_nchw, consts):
    n, c_in, h, w = x_nchw.shape
    hu, wu = 2 * h, 2 * w
    cmid_hu = consts["b1row"].shape[1]
    cout_hu = consts["b2row"].shape[1]
    c_out = cout_hu // hu

    # NCHW -> per-image transposed slab (W, Cin*H): C*H sits on lanes (lane-dense).
    xT = jnp.transpose(x_nchw.reshape(n, c_in * h, w), (0, 2, 1)).astype(jnp.bfloat16)

    out_t = pl.pallas_call(
        _decoder_block_kernel,
        out_shape=jax.ShapeDtypeStruct((n, wu, cout_hu), jnp.float32),
        grid=(n,),
        in_specs=[
            pl.BlockSpec((1, w, c_in * h), lambda i: (i, 0, 0)),
            pl.BlockSpec((c_in * h, 3 * cmid_hu), lambda i: (0, 0)),
            pl.BlockSpec((wu, 3 * w), lambda i: (0, 0)),
            pl.BlockSpec((1, cmid_hu), lambda i: (0, 0)),
            pl.BlockSpec((3 * cmid_hu, cout_hu), lambda i: (0, 0)),
            pl.BlockSpec((1, cout_hu), lambda i: (0, 0)),
        ],
        out_specs=pl.BlockSpec((1, wu, cout_hu), lambda i: (i, 0, 0)),
        scratch_shapes=[
            pltpu.VMEM((3 * w, cmid_hu), jnp.bfloat16),     # conv1 K restack
            pltpu.VMEM((wu, 3 * cmid_hu), jnp.bfloat16),    # conv2 shifted-tap concat
        ],
        compiler_params=pltpu.CompilerParams(
            dimension_semantics=("parallel",)),
    )(xT, consts["b1cat"], consts["w1cat"], consts["b1row"],
      consts["a2cat"], consts["b2row"])

    # (N, Wu, Cout*Hu) -> NCHW (N, Cout, Hu, Wu), like PyTorch.
    return jnp.transpose(out_t.reshape(n, wu, c_out, hu), (0, 2, 3, 1))


# ----------------------------------------------------------------------------
# Independent reference: gather-based upsample + lax.conv (f32 end to end)
# ----------------------------------------------------------------------------
def _upsample_bilinear_2x_ref(x_nchw):
    _, _, h, w = x_nchw.shape

    def coords(size):
        i = jnp.arange(2 * size, dtype=jnp.float32)
        src = jnp.maximum((i + 0.5) * 0.5 - 0.5, 0.0)
        i0 = jnp.floor(src).astype(jnp.int32)
        frac = src - i0.astype(jnp.float32)
        i1 = jnp.minimum(i0 + 1, size - 1)
        return i0, i1, frac

    h0, h1, fh = coords(h)
    w0, w1, fw = coords(w)
    rows = (x_nchw[:, :, h0, :] * (1.0 - fh)[None, None, :, None]
            + x_nchw[:, :, h1, :] * fh[None, None, :, None])
    return rows[:, :, :, w0] * (1.0 - fw) + rows[:, :, :, w1] * fw


def _ref_forward(x_nchw, params):
    x = _upsample_bilinear_2x_ref(x_nchw)
    for wgt, b in ((params["w1"], params["b1"]), (params["w2"], params["b2"])):
        x = jax.lax.conv_general_dilated(
            x, wgt, window_strides=(1, 1), padding=((1, 1), (1, 1)),
            dimension_numbers=("NCHW", "OIHW", "NCHW"))
        x = jnp.maximum(x + b[None, :, None, None], 0.0)
    return x


if __name__ == "__main__":
    key = jax.random.PRNGKey(0)
    kx, kp = jax.random.split(key)

    in_c, mid_c, out_c = 4, 8, 6
    x = jax.random.normal(kx, (2, in_c, 16, 16), jnp.float32)   # NCHW, like PyTorch
    params = init_decoder_block(kp, in_c, mid_c, out_c)

    # Constant folding hoisted out of the per-call forward (inference-style).
    consts = make_decoder_block_constants(params, in_c, 16, 16)

    out = jax.block_until_ready(decoder_block_forward(x, consts))
    assert out.shape == (2, out_c, 32, 32), out.shape

    ref = _ref_forward(x, params)
    err = float(jnp.max(jnp.abs(out - ref)))
    # bf16 matmul operands with f32 accumulation: relax the f32 tolerance.
    assert err < 5e-2, err

    print("KERNEL_OK")
</pallas_src>

<mosaic_0001>
module attributes {stable_mosaic.version = 11 : i64} {
  func.func @_decoder_block_kernel(%arg0: i32, %arg1: memref<1x16x64xbf16, #tpu.memory_space<vmem>>, %arg2: memref<64x768xbf16, #tpu.memory_space<vmem>>, %arg3: memref<32x48xbf16, #tpu.memory_space<vmem>>, %arg4: memref<1x256xf32, #tpu.memory_space<vmem>>, %arg5: memref<768x192xbf16, #tpu.memory_space<vmem>>, %arg6: memref<1x192xf32, #tpu.memory_space<vmem>>, %arg7: memref<1x32x192xf32, #tpu.memory_space<vmem>>, %arg8: memref<48x256xbf16, #tpu.memory_space<vmem>>, %arg9: memref<32x768xbf16, #tpu.memory_space<vmem>>) attributes {dimension_semantics = [#tpu.dimension_semantics<parallel>], iteration_bounds = array<i64: 2>, scalar_prefetch = 0 : i64, scratch_operands = 2 : i64, tpu.core_type = #tpu.core_type<tc>, window_params = [{transform_indices = @transform_0, window_bounds = array<i64: 1, 16, 64>}, {pipeline_mode = #tpu.pipeline_mode<synchronous>, transform_indices = @transform_1, window_bounds = array<i64: 64, 768>}, {pipeline_mode = #tpu.pipeline_mode<synchronous>, transform_indices = @transform_2, window_bounds = array<i64: 32, 48>}, {pipeline_mode = #tpu.pipeline_mode<synchronous>, transform_indices = @transform_3, window_bounds = array<i64: 1, 256>}, {pipeline_mode = #tpu.pipeline_mode<synchronous>, transform_indices = @transform_4, window_bounds = array<i64: 768, 192>}, {pipeline_mode = #tpu.pipeline_mode<synchronous>, transform_indices = @transform_5, window_bounds = array<i64: 1, 192>}, {transform_indices = @transform_6, window_bounds = array<i64: 1, 32, 192>}]} {
    %c0 = arith.constant 0 : index
    %c0_0 = arith.constant 0 : index
    %c0_1 = arith.constant 0 : index
    %0 = vector.load %arg1[%c0, %c0_0, %c0_1] : memref<1x16x64xbf16, #tpu.memory_space<vmem>>, vector<1x16x64xbf16>
    %1 = vector.shape_cast %0 : vector<1x16x64xbf16> to vector<16x64xbf16>
    %c0_2 = arith.constant 0 : index
    %c0_3 = arith.constant 0 : index
    %2 = vector.load %arg2[%c0_2, %c0_3] : memref<64x768xbf16, #tpu.memory_space<vmem>>, vector<64x768xbf16>
    %cst = arith.constant dense<0.000000e+00> : vector<16x768xf32>
    %3 = tpu.matmul %1, %2, %cst {dimension_numbers = #tpu.dot_dimension_numbers<[1], [0], [0], [1], [0, 0, 1, 1], [], []>} : vector<16x64xbf16>, vector<64x768xbf16>, vector<16x768xf32> -> vector<16x768xf32>
    %4 = vector.extract_strided_slice %3 {offsets = [0, 0], sizes = [16, 256], strides = [1, 1]} : vector<16x768xf32> to vector<16x256xf32>
    %5 = arith.truncf %4 : vector<16x256xf32> to vector<16x256xbf16>
    %c0_4 = arith.constant 0 : index
    %c0_5 = arith.constant 0 : index
    %6 = vector.load %arg8[%c0_4, %c0_5] : memref<48x256xbf16, #tpu.memory_space<vmem>>, vector<16x256xbf16>
    tpu.vector_store %arg8[%c0_4, %c0_5], %5 {strides = array<i32>} : memref<48x256xbf16, #tpu.memory_space<vmem>>, vector<16x256xbf16>,
    %7 = vector.extract_strided_slice %3 {offsets = [0, 256], sizes = [16, 256], strides = [1, 1]} : vector<16x768xf32> to vector<16x256xf32>
    %8 = arith.truncf %7 : vector<16x256xf32> to vector<16x256xbf16>
    %c16 = arith.constant 16 : index
    %c0_6 = arith.constant 0 : index
    %9 = vector.load %arg8[%c16, %c0_6] : memref<48x256xbf16, #tpu.memory_space<vmem>>, vector<16x256xbf16>
    tpu.vector_store %arg8[%c16, %c0_6], %8 {strides = array<i32>} : memref<48x256xbf16, #tpu.memory_space<vmem>>, vector<16x256xbf16>,
    %10 = vector.extract_strided_slice %3 {offsets = [0, 512], sizes = [16, 256], strides = [1, 1]} : vector<16x768xf32> to vector<16x256xf32>
    %11 = arith.truncf %10 : vector<16x256xf32> to vector<16x256xbf16>
    %c32 = arith.constant 32 : index
    %c0_7 = arith.constant 0 : index
    %12 = vector.load %arg8[%c32, %c0_7] : memref<48x256xbf16, #tpu.memory_space<vmem>>, vector<16x256xbf16>
    tpu.vector_store %arg8[%c32, %c0_7], %11 {strides = array<i32>} : memref<48x256xbf16, #tpu.memory_space<vmem>>, vector<16x256xbf16>,
    %c0_8 = arith.constant 0 : index
    %c0_9 = arith.constant 0 : index
    %13 = vector.load %arg3[%c0_8, %c0_9] : memref<32x48xbf16, #tpu.memory_space<vmem>>, vector<32x48xbf16>
    %c0_10 = arith.constant 0 : index
    %c0_11 = arith.constant 0 : index
    %14 = vector.load %arg8[%c0_10, %c0_11] : memref<48x256xbf16, #tpu.memory_space<vmem>>, vector<48x256xbf16>
    %cst_12 = arith.constant dense<0.000000e+00> : vector<32x256xf32>
    %15 = tpu.matmul %13, %14, %cst_12 {dimension_numbers = #tpu.dot_dimension_numbers<[1], [0], [0], [1], [0, 0, 1, 1], [], []>} : vector<32x48xbf16>, vector<48x256xbf16>, vector<32x256xf32> -> vector<32x256xf32>
    %c0_13 = arith.constant 0 : index
    %c0_14 = arith.constant 0 : index
    %16 = vector.load %arg4[%c0_13, %c0_14] : memref<1x256xf32, #tpu.memory_space<vmem>>, vector<1x256xf32>
    %17 = vector.broadcast %16 : vector<1x256xf32> to vector<32x256xf32>
    %18 = arith.addf %15, %17 : vector<32x256xf32>
    %cst_15 = arith.constant 0.000000e+00 : f32
    %19 = vector.broadcast %cst_15 : f32 to vector<32x256xf32>
    %20 = arith.maximumf %18, %19 : vector<32x256xf32>
    %21 = tpu.iota {dimensions = array<i32: 0>} : vector<32x256xi32>
    %c0_i32 = arith.constant 0 : i32
    %22 = vector.broadcast %c0_i32 : i32 to vector<32x256xi32>
    %23 = arith.cmpi eq, %21, %22 : vector<32x256xi32>
    %c1_i32 = arith.constant 1 : i32
    %24 = tpu.dynamic_rotate %20 by %c1_i32 dim 0 : vector<32x256xf32>, i32 -> vector<32x256xf32>
    %cst_16 = arith.constant 0.000000e+00 : f32
    %25 = vector.broadcast %cst_16 : f32 to vector<32x256xf32>
    %26 = arith.select %23, %25, %24 : vector<32x256xi1>, vector<32x256xf32>
    %c31_i32 = arith.constant 31 : i32
    %27 = vector.broadcast %c31_i32 : i32 to vector<32x256xi32>
    %28 = arith.cmpi eq, %21, %27 : vector<32x256xi32>
    %c31_i32_17 = arith.constant 31 : i32
    %29 = tpu.dynamic_rotate %20 by %c31_i32_17 dim 0 : vector<32x256xf32>, i32 -> vector<32x256xf32>
    %cst_18 = arith.constant 0.000000e+00 : f32
    %30 = vector.broadcast %cst_18 : f32 to vector<32x256xf32>
    %31 = arith.select %28, %30, %29 : vector<32x256xi1>, vector<32x256xf32>
    %32 = arith.truncf %26 : vector<32x256xf32> to vector<32x256xbf16>
    %c0_19 = arith.constant 0 : index
    %c0_20 = arith.constant 0 : index
    %33 = vector.load %arg9[%c0_19, %c0_20] : memref<32x768xbf16, #tpu.memory_space<vmem>>, vector<32x256xbf16>
    tpu.vector_store %arg9[%c0_19, %c0_20], %32 {strides = array<i32>} : memref<32x768xbf16, #tpu.memory_space<vmem>>, vector<32x256xbf16>,
    %34 = arith.truncf %20 : vector<32x256xf32> to vector<32x256xbf16>
    %c0_21 = arith.constant 0 : index
    %c256 = arith.constant 256 : index
    %35 = vector.load %arg9[%c0_21, %c256] : memref<32x768xbf16, #tpu.memory_space<vmem>>, vector<32x256xbf16>
    tpu.vector_store %arg9[%c0_21, %c256], %34 {strides = array<i32>} : memref<32x768xbf16, #tpu.memory_space<vmem>>, vector<32x256xbf16>,
    %36 = arith.truncf %31 : vector<32x256xf32> to vector<32x256xbf16>
    %c0_22 = arith.constant 0 : index
    %c512 = arith.constant 512 : index
    %37 = vector.load %arg9[%c0_22, %c512] : memref<32x768xbf16, #tpu.memory_space<vmem>>, vector<32x256xbf16>
    tpu.vector_store %arg9[%c0_22, %c512], %36 {strides = array<i32>} : memref<32x768xbf16, #tpu.memory_space<vmem>>, vector<32x256xbf16>,
    %c0_23 = arith.constant 0 : index
    %c0_24 = arith.constant 0 : index
    %38 = vector.load %arg9[%c0_23, %c0_24] : memref<32x768xbf16, #tpu.memory_space<vmem>>, vector<32x768xbf16>
    %c0_25 = arith.constant 0 : index
    %c0_26 = arith.constant 0 : index
    %39 = vector.load %arg5[%c0_25, %c0_26] : memref<768x192xbf16, #tpu.memory_space<vmem>>, vector<768x192xbf16>
    %cst_27 = arith.constant dense<0.000000e+00> : vector<32x192xf32>
    %40 = tpu.matmul %38, %39, %cst_27 {dimension_numbers = #tpu.dot_dimension_numbers<[1], [0], [0], [1], [0, 0, 1, 1], [], []>} : vector<32x768xbf16>, vector<768x192xbf16>, vector<32x192xf32> -> vector<32x192xf32>
    %c0_28 = arith.constant 0 : index
    %c0_29 = arith.constant 0 : index
    %41 = vector.load %arg6[%c0_28, %c0_29] : memref<1x192xf32, #tpu.memory_space<vmem>>, vector<1x192xf32>
    %42 = vector.broadcast %41 : vector<1x192xf32> to vector<32x192xf32>
    %43 = arith.addf %40, %42 : vector<32x192xf32>
    %cst_30 = arith.constant 0.000000e+00 : f32
    %44 = vector.broadcast %cst_30 : f32 to vector<32x192xf32>
    %45 = arith.maximumf %43, %44 : vector<32x192xf32>
    %c0_31 = arith.constant 0 : index
    %c0_32 = arith.constant 0 : index
    %c0_33 = arith.constant 0 : index
    %46 = vector.load %arg7[%c0_31, %c0_32, %c0_33] : memref<1x32x192xf32, #tpu.memory_space<vmem>>, vector<1x32x192xf32>
    %47 = vector.shape_cast %46 : vector<1x32x192xf32> to vector<32x192xf32>
    %48 = vector.shape_cast %45 : vector<32x192xf32> to vector<1x32x192xf32>
    tpu.vector_store %arg7[%c0_31, %c0_32, %c0_33], %48 {strides = array<i32>} : memref<1x32x192xf32, #tpu.memory_space<vmem>>, vector<1x32x192xf32>,
    return
  }
  func.func @transform_0(%arg0: i32) -> (i32, i32, i32) {
    %c0_i32 = arith.constant 0 : i32
    %c0_i32_0 = arith.constant 0 : i32
    %c0_i32_1 = arith.constant 0 : i32
    return %arg0, %c0_i32, %c0_i32_0 : i32, i32, i32
  }
  func.func @transform_1(%arg0: i32) -> (i32, i32) {
    %c0_i32 = arith.constant 0 : i32
    %c0_i32_0 = arith.constant 0 : i32
    %c0_i32_1 = arith.constant 0 : i32
    return %c0_i32, %c0_i32_0 : i32, i32
  }
  func.func @transform_2(%arg0: i32) -> (i32, i32) {
    %c0_i32 = arith.constant 0 : i32
    %c0_i32_0 = arith.constant 0 : i32
    %c0_i32_1 = arith.constant 0 : i32
    return %c0_i32, %c0_i32_0 : i32, i32
  }
  func.func @transform_3(%arg0: i32) -> (i32, i32) {
    %c0_i32 = arith.constant 0 : i32
    %c0_i32_0 = arith.constant 0 : i32
    %c0_i32_1 = arith.constant 0 : i32
    return %c0_i32, %c0_i32_0 : i32, i32
  }
  func.func @transform_4(%arg0: i32) -> (i32, i32) {
    %c0_i32 = arith.constant 0 : i32
    %c0_i32_0 = arith.constant 0 : i32
    %c0_i32_1 = arith.constant 0 : i32
    return %c0_i32, %c0_i32_0 : i32, i32
  }
  func.func @transform_5(%arg0: i32) -> (i32, i32) {
    %c0_i32 = arith.constant 0 : i32
    %c0_i32_0 = arith.constant 0 : i32
    %c0_i32_1 = arith.constant 0 : i32
    return %c0_i32, %c0_i32_0 : i32, i32
  }
  func.func @transform_6(%arg0: i32) -> (i32, i32, i32) {
    %c0_i32 = arith.constant 0 : i32
    %c0_i32_0 = arith.constant 0 : i32
    %c0_i32_1 = arith.constant 0 : i32
    return %arg0, %c0_i32, %c0_i32_0 : i32, i32, i32
  }
}

</mosaic_0001>

<bundles_post_ra>
// kernel: decoder_block_forward.1
= control target key start
LH: loop header
LB: loop body
LE: loop exit
PB: predicated region body
PF: predicated region fallthrough
CT: control target
= control target key end

     0   :  { %s2215_s21 = smov 0   ;;  %s2739_s0 = inlined_call_operand.vmem [shape: bf16[2,16,64], index: 0, kind: input, shape index: {}]   ;;  %s2740_s1 = inlined_call_operand.vmem [shape: bf16[64,768], index: 1, kind: input, shape index: {}]   ;;  %s2741_s2 = inlined_call_operand.vmem [shape: bf16[32,48], index: 2, kind: input, shape index: {}]   ;;  %s2742_s3 = inlined_call_operand.vmem [shape: f32[1,256], index: 3, kind: input, shape index: {}]   ;;  %s2743_s4 = inlined_call_operand.vmem [shape: bf16[768,192], index: 4, kind: input, shape index: {}]   ;;  %s2744_s5 = inlined_call_operand.vmem [shape: f32[1,192], index: 5, kind: input, shape index: {}]   ;;  %s2745_s6 = inlined_call_operand.vmem [shape: f32[2,32,192], index: 6, kind: output, shape index: {}]  }
   0x1 LB: > { %s1746_s22 = sadd.s32 4294967295, %s2176_s21   ;;  %p1750_p0 = scmp.ge.s32.totalorder %s2176_s21, 1  ;;  %s2176_s21 = sphi %s2215_s21, %s16_s21  }
   0x2   : > { %p212_p1 = scmp.lt.s32.totalorder %s2176_s21, 3 }
   0x4   : > { %p213_p2 = pnand %p1750_p0, %p212_p1 }
   0x5   : > { %p242_p3 = scmp.lt.s32.totalorder (!%p213_p2), %s1746_s22, 1 }
   0x6   : > { %216 = sbr.rel (%p213_p2) target bundleno = 766 (0x2fe), region = 44 }
   0xb   : > { %v1987_v0 = vld [vmem:[%s2740_s1 + $0x94] ss:$24 sps:$4 sm:$0xff]   ;;  %v1989_v1 = vld [vmem:[%s2740_s1 + $0x90] ss:$24 sps:$4 sm:$0xff]   ;;  %v2178_v2 = vmov 0   ;;  %s2749_s22 = smov (!%p242_p3, %s1746_s22), 1  ;;  %v591_v46 = vlaneseq }
   0xc   : > { %440 = vmatprep.mubr.bf16.mxu0 %v2178_v2  ;;  %416 = vmatprep.subr.bf16.mxu0 %v1987_v0  ;;  %v1990_v3 = vld [vmem:[%s2740_s1 + $0x64] ss:$24 sps:$4 sm:$0xff]   ;;  %v1992_v4 = vld [vmem:[%s2740_s1 + $0x60] ss:$24 sps:$4 sm:$0xff]   ;;  %v1993_v5 = vld [vmem:[%s2740_s1 + $0x34] ss:$24 sps:$4 sm:$0xff]  }
   0xd   : > { %417 = vmatpush1.bf16.msra.mxu0 %v1989_v1  ;;  %s1921_s9 = sshll.u32 %s2749_s22, 3  ;;  %v1995_v6 = vld [vmem:[%s2740_s1 + $0x30] ss:$24 sps:$4 sm:$0xff]   ;;  %v1996_v7 = vld [vmem:[%s2740_s1 + $0x4] ss:$24 sps:$4 sm:$0xff]   ;;  %vm404_vm0 = vcmask 523264  }
   0xe   : > { %418 = vmatprep.subr.bf16.mxu0 %v1990_v3  ;;  %s246_s12 = scalar_lea.vmem %s2739_s0, %s1921_s9  ;;  %v1998_v8 = vld [vmem:[%s2740_s1] ss:$24 sps:$4 sm:$0xff]   ;;  %v2002_v9 = vld [vmem:[%s2740_s1 + $0x9c] ss:$24 sps:$4 sm:$0xff]   ;;  %v2005_v12 = vld [vmem:[%s2740_s1 + $0x6c] ss:$24 sps:$4 sm:$0xff]  }
   0xf   : > { %v1999_v10 = vld [vmem:[%s246_s12] sm:$0xff]   ;;  %v2000_v11 = vld [vmem:[%s2740_s1 + $0x98] ss:$24 sps:$4 sm:$0xff]   ;;  %v2008_v14 = vld [vmem:[%s2740_s1 + $0x3c] ss:$24 sps:$4 sm:$0xff]   ;;  %v2368_v47 = vshrl.u32 %v591_v46, 7 }
  0x10   : > { %v2003_v13 = vld [vmem:[%s2740_s1 + $0x68] ss:$24 sps:$4 sm:$0xff]   ;;  %v2006_v15 = vld [vmem:[%s2740_s1 + $0x38] ss:$24 sps:$4 sm:$0xff]   ;;  %v2011_v16 = vld [vmem:[%s2740_s1 + $0xc] ss:$24 sps:$4 sm:$0xff]  }
  0x11   : > { %419 = vmatpush1.bf16.msra.mxu0 %v1992_v4  ;;  %v2009_v17 = vld [vmem:[%s2740_s1 + $0x8] ss:$24 sps:$4 sm:$0xff]   ;;  %v2014_v18 = vld [vmem:[%s2740_s1 + $0xa4] ss:$24 sps:$4 sm:$0xff]   ;;  %v2017_v20 = vld [vmem:[%s2740_s1 + $0x74] ss:$24 sps:$4 sm:$0xff]  }
  0x12   : > { %420 = vmatprep.subr.bf16.mxu0 %v1993_v5  ;;  %v2012_v19 = vld [vmem:[%s2740_s1 + $0xa0] ss:$24 sps:$4 sm:$0xff]   ;;  %v2015_v21 = vld [vmem:[%s2740_s1 + $0x70] ss:$24 sps:$4 sm:$0xff]   ;;  %v2020_v22 = vld [vmem:[%s2740_s1 + $0x44] ss:$24 sps:$4 sm:$0xff]  }
  0x13   : > { %v2018_v23 = vld [vmem:[%s2740_s1 + $0x40] ss:$24 sps:$4 sm:$0xff]   ;;  %v2023_v24 = vld [vmem:[%s2740_s1 + $0x14] ss:$24 sps:$4 sm:$0xff]   ;;  %v2021_v25 = vld [vmem:[%s2740_s1 + $0x10] ss:$24 sps:$4 sm:$0xff]  }
  0x14   : > { %v2035_v26 = vld [vmem:[%s2743_s4 + $0x74] ss:$8 sps:$4 sm:$0xff]   ;;  %v2037_v27 = vld [vmem:[%s2743_s4 + $0x70] ss:$8 sps:$4 sm:$0xff]   ;;  %v2041_v28 = vld [vmem:[%s2743_s4 + $0x64] ss:$8 sps:$4 sm:$0xff]  }
  0x15   : > { %421 = vmatpush1.bf16.msra.mxu0 %v1995_v6  ;;  %1516 = vmatprep.subr.bf16.mxu1 %v2035_v26  ;;  %v2043_v29 = vld [vmem:[%s2743_s4 + $0x60] ss:$8 sps:$4 sm:$0xff]   ;;  %v2047_v30 = vld [vmem:[%s2743_s4 + $0x54] ss:$8 sps:$4 sm:$0xff]   ;;  %v2049_v31 = vld [vmem:[%s2743_s4 + $0x50] ss:$8 sps:$4 sm:$0xff]  }
  0x16   : > { %422 = vmatprep.subr.bf16.mxu0 %v1996_v7  ;;  %1517 = vmatpush1.bf16.msra.mxu1 %v2037_v27  ;;  %v2053_v32 = vld [vmem:[%s2743_s4 + $0x44] ss:$8 sps:$4 sm:$0xff]   ;;  %v2055_v33 = vld [vmem:[%s2743_s4 + $0x40] ss:$8 sps:$4 sm:$0xff]   ;;  %v2059_v34 = vld [vmem:[%s2743_s4 + $0x34] ss:$8 sps:$4 sm:$0xff]  }
  0x17   : > { %1518 = vmatprep.subr.bf16.mxu1 %v2041_v28  ;;  %v2061_v35 = vld [vmem:[%s2743_s4 + $0x30] ss:$8 sps:$4 sm:$0xff]   ;;  %v2065_v36 = vld [vmem:[%s2743_s4 + $0x24] ss:$8 sps:$4 sm:$0xff]   ;;  %v2067_v37 = vld [vmem:[%s2743_s4 + $0x20] ss:$8 sps:$4 sm:$0xff]  }
  0x18   : > { %v2071_v38 = vld [vmem:[%s2743_s4 + $0x14] ss:$8 sps:$4 sm:$0xff]   ;;  %v2073_v39 = vld [vmem:[%s2743_s4 + $0x10] ss:$8 sps:$4 sm:$0xff]   ;;  %v2077_v40 = vld [vmem:[%s2743_s4 + $0x4] ss:$8 sps:$4 sm:$0xff]  }
  0x19   : > { %423 = vmatpush1.bf16.msra.mxu0 %v1998_v8  ;;  %v2079_v41 = vld [vmem:[%s2743_s4] ss:$8 sps:$4 sm:$0xff]   ;;  %v2083_v42 = vld [vmem:[%s2743_s4 + $0xf4] ss:$8 sps:$4 sm:$0xff]   ;;  %v2085_v43 = vld [vmem:[%s2743_s4 + $0xf0] ss:$8 sps:$4 sm:$0xff]  }
  0x1a   : > { %459 = vmatprep.subr.bf16.mxu0 %v2002_v9  ;;  %1519 = vmatpush1.bf16.msra.mxu1 %v2043_v29  ;;  %v2089_v44 = vld [vmem:[%s2743_s4 + $0xe4] ss:$8 sps:$4 sm:$0xff]   ;;  %v2091_v45 = vld [vmem:[%s2743_s4 + $0xe0] ss:$8 sps:$4 sm:$0xff]   ;;  %v2028_v1 = vld [vmem:[%s2743_s4 + $0x174] ss:$8 sps:$4 sm:$0xff]  }
  0x1b   : > { %1520 = vmatprep.subr.bf16.mxu1 %v2047_v30  ;;  %v2024_v4 = vld [vmem:[%s2741_s2] sm:$0xff]   ;;  %vm641_vm1 = vcmask 392192   ;;  %v2026_v5 = vld [vmem:[%s2743_s4 + $0x170] ss:$8 sps:$4 sm:$0xff]   ;;  %v2034_v8 = vld [vmem:[%s2743_s4 + $0x154] ss:$8 sps:$4 sm:$0xff]  }
  0x1c   : > { %1780 = vmatmul.mubr.msk.bf16.vlgmr.msra.gmra.mxu0 %vm404_vm0, %v1999_v10  ;;  %v2031_v6 = vld [vmem:[%s2743_s4 + $0x164] ss:$8 sps:$4 sm:$0xff]   ;;  %v2029_v7 = vld [vmem:[%s2743_s4 + $0x160] ss:$8 sps:$4 sm:$0xff]   ;;  %v2094_v28 = vld [vmem:[%s2743_s4 + $0x1b4] ss:$8 sps:$4 sm:$0xff]  }
  0x1d   : > { %460 = vmatpush1.bf16.msra.mxu0 %v2000_v11  ;;  %483 = vmatprep.mubr.bf16.mxu0 %v2178_v2  ;;  %v2025_v9 = vld [vmem:[%s2741_s2 + $0x8] sm:$0xff]   ;;  %v2092_v29 = vld [vmem:[%s2743_s4 + $0x1b0] ss:$8 sps:$4 sm:$0xff]   ;;  %v2095_v30 = vld [vmem:[%s2743_s4 + $0xd4] ss:$8 sps:$4 sm:$0xff]   ;;  %vm2179_vm3 = vmmov 1  }
  0x1e   : > { %461 = vmatprep.subr.bf16.mxu0 %v2005_v12  ;;  %1521 = vmatpush1.bf16.msra.mxu1 %v2049_v31  ;;  %v2038_v11 = vld [vmem:[%s2743_s4 + $0x140] ss:$8 sps:$4 sm:$0xff]   ;;  %v2046_v12 = vld [vmem:[%s2743_s4 + $0x134] ss:$8 sps:$4 sm:$0xff]   ;;  %v2088_v26 = vld [vmem:[%s2743_s4 + $0x1c4] ss:$8 sps:$4 sm:$0xff]  }
  0x1f   : > { %1522 = vmatprep.subr.bf16.mxu1 %v2053_v32  ;;  %v2086_v27 = vld [vmem:[%s2743_s4 + $0x1c0] ss:$8 sps:$4 sm:$0xff]   ;;  %v2097_v31 = vld [vmem:[%s2743_s4 + $0xd0] ss:$8 sps:$4 sm:$0xff]   ;;  %v2100_v32 = vld [vmem:[%s2743_s4 + $0x1a4] ss:$8 sps:$4 sm:$0xff]  }
  0x20   : > { %v2119_v46 = vld [vmem:[%s2743_s4 + $0x84] ss:$8 sps:$4 sm:$0xff]   ;;  %vm755_vm5 = vcmp.lt.s32.totalorder %v2368_v47, 7  ;;  %vm726_vm6 = vcmp.lt.s32.totalorder %v2368_v47, 1  ;;  %vm1975_vm7 = vcmp.ne.s32.totalorder %v2368_v47, 0  ;;  %s1922_s9 = sshll.u32 %s2749_s22, 6 }
  0x21   : > { %462 = vmatpush1.bf16.msra.mxu0 %v2003_v13  ;;  %v2044_v13 = vld [vmem:[%s2743_s4 + $0x130] ss:$8 sps:$4 sm:$0xff]   ;;  %vm1960_vm8 = vmpackc.low %vm2179_vm3, %vm1975_vm7  ;;  %s2722_s12 = scalar_lea.vmem %s2745_s6, %s1922_s9 }
  0x22   : > { %463 = vmatprep.subr.bf16.mxu0 %v2008_v14  ;;  %1523 = vmatpush1.bf16.msra.mxu1 %v2055_v33  ;;  %v2052_v14 = vld [vmem:[%s2743_s4 + $0x124] ss:$8 sps:$4 sm:$0xff]   ;;  %v2098_v33 = vld [vmem:[%s2743_s4 + $0x1a0] ss:$8 sps:$4 sm:$0xff]  }
  0x23   : > { %1524 = vmatprep.subr.bf16.mxu1 %v2059_v34  ;;  %v2101_v34 = vld [vmem:[%s2743_s4 + $0xc4] ss:$8 sps:$4 sm:$0xff]  }
  0x25   : > { %464 = vmatpush1.bf16.msra.mxu0 %v2006_v15  ;;  %v2050_v15 = vld [vmem:[%s2743_s4 + $0x120] ss:$8 sps:$4 sm:$0xff]  }
  0x26   : > { %465 = vmatprep.subr.bf16.mxu0 %v2011_v16  ;;  %1525 = vmatpush1.bf16.msra.mxu1 %v2061_v35  ;;  %v2058_v16 = vld [vmem:[%s2743_s4 + $0x114] ss:$8 sps:$4 sm:$0xff]   ;;  %v2103_v35 = vld [vmem:[%s2743_s4 + $0xc0] ss:$8 sps:$4 sm:$0xff]  }
  0x27   : > { %1526 = vmatprep.subr.bf16.mxu1 %v2065_v36  ;;  %v2106_v36 = vld [vmem:[%s2743_s4 + $0x194] ss:$8 sps:$4 sm:$0xff]  }
  0x29   : > { %466 = vmatpush1.bf16.msra.mxu0 %v2009_v17  ;;  %v2056_v17 = vld [vmem:[%s2743_s4 + $0x110] ss:$8 sps:$4 sm:$0xff]  }
  0x2a   : > { %502 = vmatprep.subr.bf16.mxu0 %v2014_v18  ;;  %1527 = vmatpush1.bf16.msra.mxu1 %v2067_v37  ;;  %v2064_v18 = vld [vmem:[%s2743_s4 + $0x104] ss:$8 sps:$4 sm:$0xff]   ;;  %v2104_v37 = vld [vmem:[%s2743_s4 + $0x190] ss:$8 sps:$4 sm:$0xff]  }
  0x2b   : > { %1528 = vmatprep.subr.bf16.mxu1 %v2071_v38  ;;  %v2107_v38 = vld [vmem:[%s2743_s4 + $0xb4] ss:$8 sps:$4 sm:$0xff]  }
  0x2c   : > { %1781 = vmatmul.mubr.msk.bf16.vlgmr.msra.gmra.mxu0 %vm404_vm0, %v1999_v10 }
  0x2d   : > { %503 = vmatpush1.bf16.msra.mxu0 %v2012_v19  ;;  %526 = vmatprep.mubr.bf16.mxu0 %v2178_v2  ;;  %v2062_v19 = vld [vmem:[%s2743_s4 + $0x100] ss:$8 sps:$4 sm:$0xff]  }
  0x2e   : > { %504 = vmatprep.subr.bf16.mxu0 %v2017_v20  ;;  %1529 = vmatpush1.bf16.msra.mxu1 %v2073_v39  ;;  %v2070_v20 = vld [vmem:[%s2743_s4 + $0x1f4] ss:$8 sps:$4 sm:$0xff]   ;;  %v2109_v39 = vld [vmem:[%s2743_s4 + $0xb0] ss:$8 sps:$4 sm:$0xff]  }
  0x2f   : > { %1530 = vmatprep.subr.bf16.mxu1 %v2077_v40  ;;  %v2112_v40 = vld [vmem:[%s2743_s4 + $0x184] ss:$8 sps:$4 sm:$0xff]  }
  0x31   : > { %505 = vmatpush1.bf16.msra.mxu0 %v2015_v21  ;;  %v2068_v21 = vld [vmem:[%s2743_s4 + $0x1f0] ss:$8 sps:$4 sm:$0xff]  }
  0x32   : > { %506 = vmatprep.subr.bf16.mxu0 %v2020_v22  ;;  %1531 = vmatpush1.bf16.msra.mxu1 %v2079_v41  ;;  %v2076_v22 = vld [vmem:[%s2743_s4 + $0x1e4] ss:$8 sps:$4 sm:$0xff]   ;;  %v2110_v41 = vld [vmem:[%s2743_s4 + $0x180] ss:$8 sps:$4 sm:$0xff]  }
  0x33   : > { %1532 = vmatprep.subr.bf16.mxu1 %v2083_v42  ;;  %v2113_v42 = vld [vmem:[%s2743_s4 + $0xa4] ss:$8 sps:$4 sm:$0xff]  }
  0x35   : > { %507 = vmatpush1.bf16.msra.mxu0 %v2018_v23  ;;  %v2074_v23 = vld [vmem:[%s2743_s4 + $0x1e0] ss:$8 sps:$4 sm:$0xff]  }
  0x36   : > { %508 = vmatprep.subr.bf16.mxu0 %v2023_v24  ;;  %1533 = vmatpush2.bf16.msra.mxu1 %v2085_v43  ;;  %v2082_v24 = vld [vmem:[%s2743_s4 + $0x1d4] ss:$8 sps:$4 sm:$0xff]   ;;  %v2115_v43 = vld [vmem:[%s2743_s4 + $0xa0] ss:$8 sps:$4 sm:$0xff]  }
  0x37   : > { %1534 = vmatprep.subr.bf16.mxu1 %v2089_v44  ;;  %v2116_v44 = vld [vmem:[%s2743_s4 + $0x94] ss:$8 sps:$4 sm:$0xff]  }
  0x39   : > { %509 = vmatpush1.bf16.msra.mxu0 %v2021_v25  ;;  %v2080_v25 = vld [vmem:[%s2743_s4 + $0x1d0] ss:$8 sps:$4 sm:$0xff]  }
  0x3a   : > { %1535 = vmatpush2.bf16.msra.mxu1 %v2091_v45  ;;  %v2118_v45 = vld [vmem:[%s2743_s4 + $0x90] ss:$8 sps:$4 sm:$0xff]  }
  0x3b   : > { %1536 = vmatprep.subr.bf16.mxu1 %v2095_v30 }
  0x3c   : > { %1782 = vmatmul.mubr.msk.bf16.vlgmr.msra.gmra.mxu0 %vm404_vm0, %v1999_v10  ;;  %v2032_v10 = vld [vmem:[%s2743_s4 + $0x150] ss:$8 sps:$4 sm:$0xff]  }
  0x3d   : > { %680 = vmatprep.mubr.bf16.mxu0 %v2178_v2 }
  0x3e   : > { %1537 = vmatpush2.bf16.msra.mxu1 %v2097_v31 }
  0x3f   : > { %1538 = vmatprep.subr.bf16.mxu1 %v2101_v34 }
  0x42   : > { %1539 = vmatpush2.bf16.msra.mxu1 %v2103_v35 }
  0x43   : > { %1540 = vmatprep.subr.bf16.mxu1 %v2107_v38 }
  0x46   : > { %1541 = vmatpush2.bf16.msra.mxu1 %v2109_v39 }
  0x47   : > { %1542 = vmatprep.subr.bf16.mxu1 %v2113_v42 }
  0x4a   : > { %1543 = vmatpush2.bf16.msra.mxu1 %v2115_v43 }
  0x4b   : > { %1544 = vmatprep.subr.bf16.mxu1 %v2116_v44 }
  0x4e   : > { %1545 = vmatpush2.bf16.msra.mxu1 %v2118_v45 }
  0x4f   : > { %1546 = vmatprep.subr.bf16.mxu1 %v2119_v46  ;;  %v2127_v46 = vld [vmem:[%s2743_s4 + $0x264] ss:$8 sps:$4 sm:$0xff]  }
  0xdc   : > { %v442_v48 = vpop.f32.mrf.mxu0 }
  0xde   : > { %v444_v49 = vpop.f32.mrf.mxu0 }
  0xe0   : > { %v446_v50 = vpop.f32.mrf.mxu0 }
  0xe1   : > { %v1941_v3 = vpack.c.bf16 %v446_v50, %v442_v48  ;;  %v2121_v48 = vld [vmem:[%s2743_s4 + $0x80] ss:$8 sps:$4 sm:$0xff]   ;;  %v2124_v50 = vld [vmem:[%s2743_s4 + $0x274] ss:$8 sps:$4 sm:$0xff]  }
  0xe2   : > { %v448_v51 = vpop.f32.mrf.mxu0  ;;  %1547 = vmatpush2.bf16.msra.mxu1 %v2121_v48 }
  0xe3   : > { %v1942_v0 = vpack.c.bf16 %v448_v51, %v444_v49  ;;  %v713_v49 = vadd.s32 24, %v2368_v47  ;;  %1622 = vmatprep.subr.bf16.mxu1 %v2124_v50 }
  0xe5   : > { %vm1976_vm2 = vcmp.ne.s32.totalorder %v713_v49, 31 }
  0xe6   : > { %vm2514_vm4 = vmpackc.low %vm1976_vm2, %vm2179_vm3 }
  0xec   : > { %v485_v52 = vpop.f32.mrf.mxu0 }
  0xee   : > { %v487_v53 = vpop.f32.mrf.mxu0 }
  0xf0   : > { %v489_v54 = vpop.f32.mrf.mxu0 }
  0xf1   : > { %v1943_v63 = vpack.c.bf16 %v489_v54, %v485_v52  ;;  %v593_v52 = vsub.s32 0, %v2368_v47 }
  0xf2   : > { %v491_v55 = vpop.f32.mrf.mxu0 }
  0xf3   : > { %v1944_v62 = vpack.c.bf16 %v491_v55, %v487_v53  ;;  %v589_v53 = vld [vmem:[%s2742_s3] sm:$0x3]  ;;  %v597_v55 = vsub.s32 1, %v2368_v47 }
  0xf4   : > { %v594_v54 = vrot.slane %v589_v53, %v593_v52 }
  0xfc   : > { %v528_v56 = vpop.f32.mrf.mxu0 }
  0xfe   : > { %v530_v57 = vpop.f32.mrf.mxu0 }
 0x100   : > { %v532_v58 = vpop.f32.mrf.mxu0 }
 0x101   : > { %v1945_v61 = vpack.c.bf16 %v532_v58, %v528_v56  ;;  %v598_v58 = vrot.slane %v589_v53, %v597_v55 }
 0x102   : > { %v534_v59 = vpop.f32.mrf.mxu0 }
 0x103   : > { %v1946_v60 = vpack.c.bf16 %v534_v59, %v530_v57 }
 0x105   : > { %658 = vmatprep.subr.bf16.mxu0 %v1946_v60 }
 0x106   : > { %659 = vmatpush1.bf16.msra.mxu0 %v1945_v61 }
 0x107   : > { %660 = vmatprep.subr.bf16.mxu0 %v1944_v62 }
 0x10a   : > { %661 = vmatpush1.bf16.msra.mxu0 %v1943_v63 }
 0x10b   : > { %662 = vmatprep.subr.bf16.mxu0 %v1942_v0 }
 0x10e   : > { %663 = vmatpush1.bf16.msra.mxu0 %v1941_v3 }
 0x10f   : > { %1569 = vmatprep.subr.bf16.mxu0 %v2028_v1 }
 0x111   : > { %1797 = vmatmul.mubr.msk.bf16.vlgmr.msra.gmra.mxu0 %vm641_vm1, %v2024_v4 }
 0x112   : > { %690 = vmatprep.mubr.bf16.mxu0 %v2178_v2  ;;  %1570 = vmatpush1.bf16.msra.mxu0 %v2026_v5  ;;  %v2040_v2 = vld [vmem:[%s2743_s4 + $0x144] ss:$8 sps:$4 sm:$0xff]  }
 0x113   : > { %1571 = vmatprep.subr.bf16.mxu0 %v2031_v6 }
 0x116   : > { %1572 = vmatpush1.bf16.msra.mxu0 %v2029_v7 }
 0x117   : > { %1573 = vmatprep.subr.bf16.mxu0 %v2034_v8 }
 0x119   : > { %1798 = vmatmul.mubr.msk.bf16.gmra.mxu0 %vm641_vm1, %v2025_v9 }
 0x11a   : > { %1574 = vmatpush1.bf16.msra.mxu0 %v2032_v10 }
 0x11b   : > { %1575 = vmatprep.subr.bf16.mxu0 %v2040_v2 }
 0x11e   : > { %1576 = vmatpush1.bf16.msra.mxu0 %v2038_v11 }
 0x11f   : > { %1577 = vmatprep.subr.bf16.mxu0 %v2046_v12 }
 0x122   : > { %1578 = vmatpush1.bf16.msra.mxu0 %v2044_v13 }
 0x123   : > { %1579 = vmatprep.subr.bf16.mxu0 %v2052_v14 }
 0x126   : > { %1580 = vmatpush1.bf16.msra.mxu0 %v2050_v15 }
 0x127   : > { %1581 = vmatprep.subr.bf16.mxu0 %v2058_v16 }
 0x12a   : > { %1582 = vmatpush1.bf16.msra.mxu0 %v2056_v17 }
 0x12b   : > { %1583 = vmatprep.subr.bf16.mxu0 %v2064_v18 }
 0x12e   : > { %1584 = vmatpush1.bf16.msra.mxu0 %v2062_v19 }
 0x12f   : > { %1585 = vmatprep.subr.bf16.mxu0 %v2070_v20 }
 0x132   : > { %1586 = vmatpush2.bf16.msra.mxu0 %v2068_v21 }
 0x133   : > { %1587 = vmatprep.subr.bf16.mxu0 %v2076_v22 }
 0x136   : > { %1588 = vmatpush2.bf16.msra.mxu0 %v2074_v23 }
 0x137   : > { %1589 = vmatprep.subr.bf16.mxu0 %v2082_v24 }
 0x13a   : > { %1590 = vmatpush2.bf16.msra.mxu0 %v2080_v25 }
 0x13b   : > { %1591 = vmatprep.subr.bf16.mxu0 %v2088_v26 }
 0x13e   : > { %1592 = vmatpush2.bf16.msra.mxu0 %v2086_v27 }
 0x13f   : > { %1593 = vmatprep.subr.bf16.mxu0 %v2094_v28 }
 0x142   : > { %1594 = vmatpush2.bf16.msra.mxu0 %v2092_v29 }
 0x143   : > { %1595 = vmatprep.subr.bf16.mxu0 %v2100_v32 }
 0x146   : > { %1596 = vmatpush2.bf16.msra.mxu0 %v2098_v33 }
 0x147   : > { %1597 = vmatprep.subr.bf16.mxu0 %v2106_v36 }
 0x14a   : > { %1598 = vmatpush2.bf16.msra.mxu0 %v2104_v37 }
 0x14b   : > { %1599 = vmatprep.subr.bf16.mxu0 %v2112_v40 }
 0x14e   : > { %1600 = vmatpush2.bf16.msra.mxu0 %v2110_v41  ;;  %v2122_v41 = vld [vmem:[%s2743_s4 + $0x270] ss:$8 sps:$4 sm:$0xff]  }
 0x1d1   : > { %v682_v56 = vpop.f32.mrf.mxu0 }
 0x1d2   : > { %v683_v57 = vadd.f32 %v682_v56, %v594_v54 }
 0x1d3   : > { %v684_v59 = vpop.f32.mrf.mxu0 }
 0x1d4   : > { %v701_v61 = vmax.f32 %v683_v57, 0.0  ;;  %v685_v63 = vadd.f32 %v684_v59, %v598_v58  ;;  %v2130_v57 = vld [vmem:[%s2743_s4 + $0x254] ss:$8 sps:$4 sm:$0xff]  }
 0x1d5   : > { %v686_v60 = vpop.f32.mrf.mxu0 }
 0x1d6   : > { %v687_v62 = vadd.f32 %v686_v60, %v594_v54  ;;  %v747_v5 = vrot.slane %v701_v61, 1  ;;  %v2533_v8 = vmax.f32 %v685_v63, 0.0  ;;  %v718_v28 = vrot.slane %v701_v61, 7 }
 0x1d7   : > { %v688_v0 = vpop.f32.mrf.mxu0 }
 0x1d8   : > { %v2527_v1 = vmax.f32 %v687_v62, 0.0  ;;  %v689_v3 = vadd.f32 %v688_v0, %v598_v58  ;;  %v719_v30 = vrot.slane %v2533_v8, 7  ;;  %v748_v59 = vrot.slane %v2533_v8, 1 }
 0x1d9   : > { %v692_v4 = vpop.f32.mrf.mxu0 }
 0x1da   : > { %v749_v6 = vrot.slane %v2527_v1, 1  ;;  %v2531_v7 = vmax.f32 %v689_v3, 0.0  ;;  %v693_v9 = vadd.f32 %v692_v4, %v594_v54  ;;  %v1949_v15 = vpack.c.bf16 %v2527_v1, %v701_v61  ;;  %v2128_v61 = vld [vmem:[%s2743_s4 + $0x250] ss:$8 sps:$4 sm:$0xff]   ;;  %v2131_v4 = vld [vmem:[%s2743_s4 + $0x240] ss:$8 sps:$4 sm:$0xff]  }
 0x1db   : > { %v694_v10 = vpop.f32.mrf.mxu0  ;;  %v720_v29 = vrot.slane %v2527_v1, 7  ;;  %v2133_v1 = vld [vmem:[%s2743_s4 + $0x244] ss:$8 sps:$4 sm:$0xff]  }
 0x1dc   : > { %v2537_v2 = vsel %vm755_vm5, %v747_v5, %v749_v6  ;;  %v695_v11 = vadd.f32 %v694_v10, %v598_v58  ;;  %v705_v12 = vmax.f32 %v693_v9, 0.0  ;;  %v1950_v14 = vpack.c.bf16 %v2531_v7, %v2533_v8  ;;  %v2137_v9 = vld [vmem:[%s2743_s4 + $0x220] ss:$8 sps:$4 sm:$0xff]   ;;  %v2142_v10 = vld [vmem:[%s2743_s4 + $0x214] ss:$8 sps:$4 sm:$0xff]  }
 0x1dd   : > { %v696_v13 = vpop.f32.mrf.mxu0  ;;  %v721_v22 = vrot.slane %v2531_v7, 7  ;;  %v731_v42 = vsel %vm726_vm6, %v718_v28, %v720_v29  ;;  %v750_v56 = vrot.slane %v2531_v7, 1  ;;  %v2139_v7 = vld [vmem:[%s2743_s4 + $0x224] ss:$8 sps:$4 sm:$0xff]  }
 0x1de   : > { %v697_v16 = vadd.f32 %v696_v13, %v594_v54  ;;  %v751_v17 = vrot.slane %v705_v12, 1  ;;  %1601 = vmatprep.mubr.bf16.mxu0 %v1950_v14  ;;  %v2542_v19 = vmax.f32 %v695_v11, 0.0  ;;  %v722_v53 = vrot.slane %v705_v12, 7  ;;  %v2125_v54 = vld [vmem:[%s2743_s4 + $0x260] ss:$8 sps:$4 sm:$0xff]  }
 0x1df   : > { %v698_v18 = vpop.f32.mrf.mxu0  ;;  %1602 = vmatmul.mubr.bf16.vlgmr.msra.gmra.mxu0 %v1949_v15  ;;  %v732_v37 = vsel %vm726_vm6, %v719_v30, %v721_v22  ;;  %v761_v0 = vsel %vm755_vm5, %v748_v59, %v750_v56  ;;  %v2140_v11 = vld [vmem:[%s2743_s4 + $0x210] ss:$8 sps:$4 sm:$0xff]   ;;  %v2143_v13 = vld [vmem:[%s2743_s4 + $0x200] ss:$8 sps:$4 sm:$0xff]   ;;  %v2148_v14 = vld [vmem:[%s2743_s4 + $0x2f4] ss:$8 sps:$4 sm:$0xff]  }
 0x1e0   : > { %v707_v20 = vmax.f32 %v697_v16, 0.0  ;;  %v699_v21 = vadd.f32 %v698_v18, %v598_v58  ;;  %v2547_v23 = vsel %vm755_vm5, %v749_v6, %v751_v17  ;;  %v723_v31 = vrot.slane %v2542_v19, 7  ;;  %v2134_v6 = vld [vmem:[%s2743_s4 + $0x230] ss:$8 sps:$4 sm:$0xff]   ;;  %v2151_v16 = vld [vmem:[%s2743_s4 + $0x2e4] ss:$8 sps:$4 sm:$0xff]  }
 0x1e1   : > { %v1951_v24 = vpack.c.bf16 %v2547_v23, %v2537_v2  ;;  %v752_v50 = vrot.slane %v2542_v19, 1  ;;  %v729_v62 = vsel %vm726_vm6, %v720_v29, %v722_v53  ;;  %v2146_v15 = vld [vmem:[%s2743_s4 + $0x2f0] ss:$8 sps:$4 sm:$0xff]   ;;  %v2154_v18 = vld [vmem:[%s2743_s4 + $0x2d4] ss:$8 sps:$4 sm:$0xff]  }
 0x1e2   : > { %v724_v25 = vrot.slane %v707_v20, 7  ;;  %v753_v26 = vrot.slane %v707_v20, 1  ;;  %v2551_v27 = vmax.f32 %v699_v21, 0.0  ;;  %v1955_v36 = vpack.c.bf16 %v707_v20, %v705_v12  ;;  %v2145_v12 = vld [vmem:[%s2743_s4 + $0x204] ss:$8 sps:$4 sm:$0xff]  }
 0x1e3   : > { %v730_v45 = vsel %vm726_vm6, %v721_v22, %v723_v31  ;;  %v759_v60 = vsel %vm755_vm5, %v750_v56, %v752_v50  ;;  %v2152_v20 = vld [vmem:[%s2743_s4 + $0x2d0] ss:$8 sps:$4 sm:$0xff]   ;;  %v2157_v21 = vld [vmem:[%s2743_s4 + $0x2c4] ss:$8 sps:$4 sm:$0xff]   ;;  %v2155_v22 = vld [vmem:[%s2743_s4 + $0x2c0] ss:$8 sps:$4 sm:$0xff]  }
 0x1e4   : > { %v725_v32 = vrot.slane %v2551_v27, 7  ;;  %v1956_v33 = vpack.c.bf16 %v2551_v27, %v2542_v19  ;;  %v733_v34 = vsel %vm726_vm6, %v724_v25, %v718_v28  ;;  %v2565_v35 = vsel %vm755_vm5, %v751_v17, %v753_v26  ;;  %v2149_v17 = vld [vmem:[%s2743_s4 + $0x2e0] ss:$8 sps:$4 sm:$0xff]   ;;  %v2163_v28 = vld [vmem:[%s2743_s4 + $0x2a4] ss:$8 sps:$4 sm:$0xff]  }
 0x1e5   : > { %v2581_v43 = vsel %vm755_vm5, %v753_v26, %v747_v5  ;;  %v1965_v44 = vpack.c.bf16 %v731_v42, %v733_v34  ;;  %v727_v58 = vsel %vm726_vm6, %v722_v53, %v724_v25  ;;  %v1952_v3 = vpack.c.bf16 %v759_v60, %v761_v0  ;;  %v2136_v5 = vld [vmem:[%s2743_s4 + $0x234] ss:$8 sps:$4 sm:$0xff]   ;;  %v2158_v26 = vld [vmem:[%s2743_s4 + $0x2b0] ss:$8 sps:$4 sm:$0xff]   ;;  %v2161_v29 = vld [vmem:[%s2743_s4 + $0x2a0] ss:$8 sps:$4 sm:$0xff]  }
 0x1e6   : > { %1611 = vmatprep.mubr.bf16.mxu0 %v1956_v33  ;;  %v734_v38 = vsel %vm726_vm6, %v725_v32, %v719_v30  ;;  %v728_v39 = vsel %vm726_vm6, %v723_v31, %v725_v32  ;;  %v1973_v48 = vpack.c.bf16 %v2581_v43, %v2565_v35  ;;  %v1953_v63 = vpack.c.bf16 %v727_v58, %v729_v62  ;;  %v2160_v25 = vld [vmem:[%s2743_s4 + $0x2b4] ss:$8 sps:$4 sm:$0xff]   ;;  %v2164_v31 = vld [vmem:[%s2743_s4 + $0x290] ss:$8 sps:$4 sm:$0xff]   ;;  %v2169_v32 = vld [vmem:[%s2743_s4 + $0x284] ss:$8 sps:$4 sm:$0xff]  }
 0x1e7   : > { %v1961_v40 = vpack.c.bf16 %v732_v37, %v734_v38  ;;  %1612 = vmatmul.mubr.bf16.gmra.mxu0 %v1955_v36  ;;  %v1954_v49 = vpack.c.bf16 %v728_v39, %v730_v45  ;;  %v2166_v30 = vld [vmem:[%s2743_s4 + $0x294] ss:$8 sps:$4 sm:$0xff]   ;;  %v754_v33 = vrot.slane %v2551_v27, 1  ;;  %v2167_v34 = vld [vmem:[%s2743_s4 + $0x280] ss:$8 sps:$4 sm:$0xff]  }
 0x1e8   : > { %v964_v2 = vld [vmem:[%s2744_s5] sm:$0x3] }
 0x1e9   : > { %1962 = vmatprep.mubr.msk.bf16.mxu1 %vm1960_vm8, %v1961_v40  ;;  %v757_v36 = vsel %vm755_vm5, %v752_v50, %v754_v33  ;;  %v763_v37 = vsel %vm755_vm5, %v754_v33, %v748_v59  ;;  %v973_v51 = vrot.slane %v964_v2, %v597_v55 }
 0x1ea   : > { %1966 = vmatmul.mubr.msk.bf16.vlgmr.msra.gmra.mxu1 %vm1960_vm8, %v1965_v44  ;;  %v1969_v38 = vpack.c.bf16 %v763_v37, %v757_v36 }
 0x1eb   : > { %1623 = vmatpush1.bf16.msra.mxu1 %v2122_v41  ;;  %1558 = vmatprep.mubr.bf16.mxu1 %v1954_v49 }
 0x1ec   : > { %1624 = vmatprep.subr.bf16.mxu1 %v2127_v46 }
 0x1ef   : > { %1625 = vmatpush1.bf16.msra.mxu1 %v2125_v54 }
 0x1f0   : > { %1626 = vmatprep.subr.bf16.mxu1 %v2130_v57 }
 0x1f2   : > { %1559 = vmatmul.mubr.bf16.gmra.mxu1 %v1953_v63 }
 0x1f3   : > { %1627 = vmatpush1.bf16.msra.mxu1 %v2128_v61  ;;  %1654 = vmatprep.mubr.bf16.mxu1 %v1952_v3 }
 0x1f4   : > { %1628 = vmatprep.subr.bf16.mxu1 %v2133_v1 }
 0x1f7   : > { %1629 = vmatpush1.bf16.msra.mxu1 %v2131_v4 }
 0x1f8   : > { %1630 = vmatprep.subr.bf16.mxu1 %v2136_v5 }
 0x1fb   : > { %1631 = vmatpush1.bf16.msra.mxu1 %v2134_v6 }
 0x1fc   : > { %1632 = vmatprep.subr.bf16.mxu1 %v2139_v7 }
 0x1ff   : > { %1633 = vmatpush1.bf16.msra.mxu1 %v2137_v9 }
 0x200   : > { %1634 = vmatprep.subr.bf16.mxu1 %v2142_v10 }
 0x203   : > { %1635 = vmatpush1.bf16.msra.mxu1 %v2140_v11 }
 0x204   : > { %1636 = vmatprep.subr.bf16.mxu1 %v2145_v12 }
 0x207   : > { %1637 = vmatpush1.bf16.msra.mxu1 %v2143_v13 }
 0x208   : > { %1638 = vmatprep.subr.bf16.mxu1 %v2148_v14 }
 0x20b   : > { %1639 = vmatpush2.bf16.msra.mxu1 %v2146_v15 }
 0x20c   : > { %1640 = vmatprep.subr.bf16.mxu1 %v2151_v16 }
 0x20f   : > { %1641 = vmatpush2.bf16.msra.mxu1 %v2149_v17 }
 0x210   : > { %1642 = vmatprep.subr.bf16.mxu1 %v2154_v18 }
 0x213   : > { %1643 = vmatpush2.bf16.msra.mxu1 %v2152_v20 }
 0x214   : > { %1644 = vmatprep.subr.bf16.mxu1 %v2157_v21 }
 0x217   : > { %1645 = vmatpush2.bf16.msra.mxu1 %v2155_v22 }
 0x218   : > { %1646 = vmatprep.subr.bf16.mxu1 %v2160_v25 }
 0x21b   : > { %1647 = vmatpush2.bf16.msra.mxu1 %v2158_v26 }
 0x21c   : > { %1648 = vmatprep.subr.bf16.mxu1 %v2163_v28 }
 0x21f   : > { %1649 = vmatpush2.bf16.msra.mxu1 %v2161_v29 }
 0x220   : > { %1650 = vmatprep.subr.bf16.mxu1 %v2166_v30 }
 0x223   : > { %1651 = vmatpush2.bf16.msra.mxu1 %v2164_v31 }
 0x224   : > { %1652 = vmatprep.subr.bf16.mxu1 %v2169_v32 }
 0x227   : > { %1653 = vmatpush2.bf16.msra.mxu1 %v2167_v34 }
 0x22a   : > { %1655 = vmatmul.mubr.bf16.vlgmr.msra.gmra.mxu1 %v1951_v24  ;;  %v969_v24 = vrot.slane %v964_v2, %v593_v52 }
 0x22b   : > { %1970 = vmatprep.mubr.msk.bf16.mxu1 %vm2514_vm4, %v1969_v38 }
 0x232   : > { %1974 = vmatmul.mubr.msk.bf16.gmra.mxu1 %vm2514_vm4, %v1973_v48 }
 0x29f   : > { %v1603_v40 = vpop.f32.mrf.mxu0 }
 0x2a1   : > { %v1605_v42 = vpop.f32.mrf.mxu0 }
 0x2a3   : > { %v1607_v35 = vpop.f32.mrf.mxu0 }
 0x2a5   : > { %v1609_v45 = vpop.f32.mrf.mxu0 }
 0x2a7   : > { %v1613_v53 = vpop.f32.mrf.mxu0 }
 0x2a9   : > { %v1615_v61 = vpop.f32.mrf.mxu0 }
 0x2aa   : > { %v1550_v19 = vpop.f32.mrf.mxu1 }
 0x2ab   : > { %v1551_v44 = vadd.f32 %v1550_v19, %v969_v24  ;;  %v1617_v10 = vpop.f32.mrf.mxu0 }
 0x2ac   : > { %v1552_v8 = vpop.f32.mrf.mxu1 }
 0x2ad   : > { %v1553_v46 = vadd.f32 %v1552_v8, %v973_v51  ;;  %v1604_v50 = vadd.f32 %v1603_v40, %v1551_v44  ;;  %v1619_v21 = vpop.f32.mrf.mxu0 }
 0x2ae   : > { %v1554_v27 = vpop.f32.mrf.mxu1 }
 0x2af   : > { %v1555_v49 = vadd.f32 %v1554_v27, %v969_v24  ;;  %v1606_v58 = vadd.f32 %v1605_v42, %v1553_v46 }
 0x2b0   : > { %v1556_v39 = vpop.f32.mrf.mxu1 }
 0x2b1   : > { %v1557_v56 = vadd.f32 %v1556_v39, %v973_v51  ;;  %v1608_v60 = vadd.f32 %v1607_v35, %v1555_v49 }
 0x2b2   : > { %v1560_v41 = vpop.f32.mrf.mxu1 }
 0x2b3   : > { %v1561_v52 = vadd.f32 %v1560_v41, %v969_v24  ;;  %v1610_v3 = vadd.f32 %v1609_v45, %v1557_v56 }
 0x2b4   : > { %v1562_v23 = vpop.f32.mrf.mxu1 }
 0x2b5   : > { %v1563_v63 = vadd.f32 %v1562_v23, %v973_v51  ;;  %v1614_v9 = vadd.f32 %v1613_v53, %v1561_v52 }
 0x2b6   : > { %v1564_v43 = vpop.f32.mrf.mxu1 }
 0x2b7   : > { %v1565_v5 = vadd.f32 %v1564_v43, %v969_v24  ;;  %v1616_v15 = vadd.f32 %v1615_v61, %v1563_v63 }
 0x2b8   : > { %v1566_v48 = vpop.f32.mrf.mxu1 }
 0x2b9   : > { %v1567_v12 = vadd.f32 %v1566_v48, %v973_v51  ;;  %v1618_v20 = vadd.f32 %v1617_v10, %v1565_v5 }
 0x2bb   : > { %v1620_v28 = vadd.f32 %v1619_v21, %v1567_v12 }
 0x2ea   : > { %v1656_v54 = vpop.f32.mrf.mxu1 }
 0x2eb   : > { %v1657_v57 = vadd.f32 %v1656_v54, %v1604_v50 }
 0x2ec   : > { %v1658_v47 = vpop.f32.mrf.mxu1 }
 0x2ed   : > { %v1675_v55 = vmax.f32 %v1657_v57, 0.0  ;;  %v1659_v59 = vadd.f32 %v1658_v47, %v1606_v58 }
 0x2ee   : > { %v1660_v62 = vpop.f32.mrf.mxu1 }
 0x2ef   : > { %1683 = vst [vmem:[%s2722_s12] sm:$0xff] %v1675_v55  ;;  %v1676_v0 = vmax.f32 %v1659_v59, 0.0  ;;  %v1661_v1 = vadd.f32 %v1660_v62, %v1608_v60 }
 0x2f0   : > { %v1662_v4 = vpop.f32.mrf.mxu1 }
 0x2f1   : > { %1684 = vst.msk [vmem:[%s2722_s12 + $0x8] sm:$0xff] %vm404_vm0, %v1676_v0  ;;  %v1677_v6 = vmax.f32 %v1661_v1, 0.0  ;;  %v1663_v7 = vadd.f32 %v1662_v4, %v1610_v3 }
 0x2f2   : > { %v1666_v11 = vpop.f32.mrf.mxu1 }
 0x2f3   : > { %1685 = vst [vmem:[%s2722_s12 + $0x10] sm:$0xff] %v1677_v6  ;;  %v1678_v13 = vmax.f32 %v1663_v7, 0.0  ;;  %v1667_v14 = vadd.f32 %v1666_v11, %v1614_v9 }
 0x2f4   : > { %v1668_v16 = vpop.f32.mrf.mxu1 }
 0x2f5   : > { %1686 = vst.msk [vmem:[%s2722_s12 + $0x18] sm:$0xff] %vm404_vm0, %v1678_v13  ;;  %v1679_v17 = vmax.f32 %v1667_v14, 0.0  ;;  %v1669_v18 = vadd.f32 %v1668_v16, %v1616_v15 }
 0x2f6   : > { %v1670_v22 = vpop.f32.mrf.mxu1 }
 0x2f7   : > { %1687 = vst [vmem:[%s2722_s12 + $0x20] sm:$0xff] %v1679_v17  ;;  %v1680_v25 = vmax.f32 %v1669_v18, 0.0  ;;  %v1671_v26 = vadd.f32 %v1670_v22, %v1618_v20 }
 0x2f8   : > { %v1672_v29 = vpop.f32.mrf.mxu1 }
 0x2f9   : > { %1688 = vst.msk [vmem:[%s2722_s12 + $0x28] sm:$0xff] %vm404_vm0, %v1680_v25  ;;  %v1681_v30 = vmax.f32 %v1671_v26, 0.0  ;;  %v1673_v31 = vadd.f32 %v1672_v29, %v1620_v28 }
 0x2fb   : > { %1689 = vst [vmem:[%s2722_s12 + $0x30] sm:$0xff] %v1681_v30  ;;  %v1682_v32 = vmax.f32 %v1673_v31, 0.0 }
 0x2fd   : > { %1690 = vst.msk [vmem:[%s2722_s12 + $0x38] sm:$0xff] %vm404_vm0, %v1682_v32 }
 0x2fe PF: > { %s16_s21 = sadd.s32 1, %s2176_s21  }
 0x2ff   : > { %p13_p4 = scmp.ge.s32.totalorder %s16_s21, 4  }
 0x301   :  { %15 = sbr.rel (!%p13_p4) target bundleno = 1 (0x1), region = 74 }

</bundles_post_ra>
